<compile_context>
chip_gen: v7x
topology: tpu7x:2x2x1
jax: 0.10.0
libtpu: 0.0.40
codegen_flags: <defaults>
</compile_context>

<pallas_src>
import functools

import jax
import jax.numpy as jnp
from jax import lax
from jax.experimental import pallas as pl
from jax.experimental.pallas import tpu as pltpu

LANE = 128           # lane width / padding granularity
ROW_TILE_CAP = 512   # destination-row tile cap
K_TILE_CAP = 2048    # reduction (source-node) tile cap


def _round_up(n, m):
    return ((n + m - 1) // m) * m


def _plan(n, cap, *, min_tiles=1):
    """Tile size (multiple of LANE, ~<= cap) and padded extent (multiple of the tile)."""
    n128 = _round_up(max(int(n), 1), LANE)
    nt = max(-(-n128 // cap), min_tiles)
    nt = max(min(nt, n128 // LANE), 1)           # never below one LANE per tile
    tile = _round_up(-(-n128 // nt), LANE)
    return tile, nt * tile


# ---------------------------------------------------------------------------- kernel


def _ngcf_kernel(kblk_ref, cnt_ref, adj_ref, f_nbr_ref, f_self_ref, inv_ref,
                 w1_ref, w2_ref, o_ref, acc_ref):
    i = pl.program_id(0)
    k = pl.program_id(1)

    @pl.when(k == 0)
    def _init():
        acc_ref[...] = jnp.zeros_like(acc_ref)

    # acc += A_tile @ (D_src^{-1/2} F_other)_tile. The adjacency tile is exact 0/1 bf16
    # (HBM stream halved); cast to f32 in-vreg so accumulation matches the f32 reference.
    # Skipped entirely (no matmul; and no DMA via the repeated block index) for zero blocks.
    @pl.when(k < cnt_ref[i])
    def _accumulate():
        acc_ref[...] += jnp.dot(adj_ref[...].astype(jnp.float32), f_nbr_ref[...],
                                preferred_element_type=jnp.float32)

    @pl.when(k == pl.num_programs(1) - 1)
    def _epilogue():
        f_self = f_self_ref[...]
        agg = acc_ref[...] * inv_ref[...]          # D_dst^{-1/2} row scaling
        # Two fused MXU matmuls (no (tm, 2*d_pad) concat temp). The padded "ones" column
        # makes (f_self+agg)[:, d_in] == 1 + deg_norm and (agg*f_self)[:, d_in] == deg_norm,
        # so the bias rows of w1/w2 reproduce b1 + deg_norm*(b1+b2) exactly.
        h = jnp.dot(f_self + agg, w1_ref[...], preferred_element_type=jnp.float32)
        h = h + jnp.dot(agg * f_self, w2_ref[...], preferred_element_type=jnp.float32)
        h = jnp.where(h > 0.0, h, 0.2 * h)         # LeakyReLU(0.2)
        # TODO(synk): nn.Dropout is eval-mode identity here (torch RNG not reproducible).
        sumsq = jnp.sum(h * h, axis=-1, keepdims=True)
        h = h * lax.rsqrt(jnp.maximum(sumsq, 1e-24))   # == F.normalize(dim=1, eps=1e-12)
        o_ref[...] = h


# ------------------------------------------------------------------- per-node-type pass


def _block_schedule(adj_pad, tm, tk):
    """Per-row-tile list of nonzero K-block indices, padded by repeating the last valid one
    (consecutive identical block indices are not re-DMA'd by the Pallas pipeline)."""
    nm = adj_pad.shape[0] // tm
    nk = adj_pad.shape[1] // tk
    occ = jnp.any(adj_pad.reshape(nm, tm, nk, tk) != 0, axis=(1, 3))        # (nm, nk)
    counts = jnp.sum(occ, axis=1).astype(jnp.int32)                          # (nm,)
    order = jnp.argsort(jnp.where(occ, 0, 1).astype(jnp.int32), axis=1)      # nonzero blocks first
    order = order.astype(jnp.int32)
    last = jnp.take_along_axis(order, jnp.maximum(counts - 1, 0)[:, None], axis=1)
    pos = jnp.arange(nk, dtype=jnp.int32)[None, :]
    kblk = jnp.where(pos < counts[:, None], order, last)
    return kblk.reshape(-1), counts


def ngcf_ntype_forward(adj_pad, f_nbr_pad, f_self_pad, inv_dst_col, w1f, w2f, *, tm, tk):
    """One node-type pass. adj_pad is the raw 0/1 bf16 adjacency (dst rows, src cols)."""
    n_dst, d_pad = f_self_pad.shape
    n_src = f_nbr_pad.shape[0]
    d_out_pad = w1f.shape[1]
    nm, nk = n_dst // tm, n_src // tk

    kblk, counts = _block_schedule(adj_pad, tm, tk)

    def adj_map(i, k, kblk, cnt):
        return (i, kblk[i * nk + k])

    def nbr_map(i, k, kblk, cnt):
        return (kblk[i * nk + k], 0)

    def row_map(i, k, kblk, cnt):
        return (i, 0)

    def fixed_map(i, k, kblk, cnt):
        return (0, 0)

    return pl.pallas_call(
        _ngcf_kernel,
        out_shape=jax.ShapeDtypeStruct((n_dst, d_out_pad), jnp.float32),
        grid_spec=pltpu.PrefetchScalarGridSpec(
            num_scalar_prefetch=2,                    # kblk (nm*nk,), counts (nm,) in SMEM
            grid=(nm, nk),
            in_specs=[
                pl.BlockSpec((tm, tk), adj_map),              # raw 0/1 adjacency (bf16)
                pl.BlockSpec((tk, d_pad), nbr_map),           # D_src^{-1/2}-scaled neighbor feats
                pl.BlockSpec((tm, d_pad), row_map),           # self feats (+ ones column)
                pl.BlockSpec((tm, 1), row_map),               # D_dst^{-1/2}
                pl.BlockSpec((d_pad, d_out_pad), fixed_map),  # [W1ᵀ; b1] (resident)
                pl.BlockSpec((d_pad, d_out_pad), fixed_map),  # [W2ᵀ; b2] (resident)
            ],
            out_specs=pl.BlockSpec((tm, d_out_pad), row_map),  # lane-dense output
            scratch_shapes=[pltpu.VMEM((tm, d_pad), jnp.float32)],  # agg accumulator
        ),
        compiler_params=pltpu.CompilerParams(
            dimension_semantics=("parallel", "arbitrary"),
            vmem_limit_bytes=32 * 1024 * 1024,
        ),
    )(kblk, counts, adj_pad, f_nbr_pad, f_self_pad, inv_dst_col, w1f, w2f)


# --------------------------------------------------------------------------- wrapper


def _pad_feat(feat, scale, d_in, d_pad, n_pad):
    """Rows [feat, 1] (optionally row-scaled by `scale`), zero-padded to (n_pad, d_pad) f32."""
    n = feat.shape[0]
    f = jnp.concatenate([feat.astype(jnp.float32), jnp.ones((n, 1), jnp.float32)], axis=1)
    if scale is not None:
        f = f * scale[:, None]
    return jnp.zeros((n_pad, d_pad), jnp.float32).at[:n, :d_in + 1].set(f)


def _pad_adj_bf16(adj, n_rows_pad, n_cols_pad):
    nr, nc = adj.shape
    return jnp.zeros((n_rows_pad, n_cols_pad), jnp.bfloat16).at[:nr, :nc].set(
        adj.astype(jnp.bfloat16))


def _fused_weight(wt, b, d_in, d_pad, d_out, d_out_pad):
    w = jnp.zeros((d_pad, d_out_pad), jnp.float32)
    w = w.at[:d_in, :d_out].set(wt.astype(jnp.float32))
    w = w.at[d_in, :d_out].set(b.reshape(-1).astype(jnp.float32))
    return w


@functools.partial(jax.jit, static_argnames=("row_tile_cap", "k_tile_cap"))
def ngcf_layer_forward(feat_user, feat_item, adj_ui, params, *,
                       row_tile_cap=ROW_TILE_CAP, k_tile_cap=K_TILE_CAP):
    """Full NGCFLayer_ori forward over both node types (eval mode).

    adj_ui: (n_users, n_items) raw 0/1 interaction adjacency.
    params: (w1t, b1, w2t, b2); w*t shape (in, out), b* shape (1, out).
    """
    w1t, b1, w2t, b2 = params
    n_users, d_in = feat_user.shape
    n_items = feat_item.shape[0]
    d_out = w1t.shape[1]

    d_pad = _round_up(d_in + 1, LANE)       # +1 for the ones column (bias / deg folding)
    d_out_pad = _round_up(d_out, LANE)      # lane-dense output stores

    adj_f32 = adj_ui.astype(jnp.float32)
    deg_u = jnp.sum(adj_f32, axis=1)
    deg_i = jnp.sum(adj_f32, axis=0)
    inv_u = jnp.where(deg_u > 0, 1.0 / jnp.sqrt(jnp.maximum(deg_u, 1.0)), 0.0)
    inv_i = jnp.where(deg_i > 0, 1.0 / jnp.sqrt(jnp.maximum(deg_i, 1.0)), 0.0)

    # Independent tile plans per role; node counts are padded up to a tile multiple so tiles
    # never collapse to 128 on awkward sizes. Rows keep >= 2 tiles when possible (v7x 2 TCs).
    tm_u, n_u_rows = _plan(n_users, row_tile_cap, min_tiles=2)
    tm_i, n_i_rows = _plan(n_items, row_tile_cap, min_tiles=2)
    tk_u, n_u_k = _plan(n_users, k_tile_cap)
    tk_i, n_i_k = _plan(n_items, k_tile_cap)

    # Raw 0/1 adjacency in exact bf16, padded once per orientation; the item-side copy is a
    # one-time HBM transpose so both passes run plain (tm,tk)x(tk,d) MXU matmuls.
    adj_u = _pad_adj_bf16(adj_ui, n_u_rows, n_i_k)          # user rows <- item cols
    adj_i = _pad_adj_bf16(adj_ui.T, n_i_rows, n_u_k)        # item rows <- user cols

    fu_self = _pad_feat(feat_user, None, d_in, d_pad, n_u_rows)
    fi_self = _pad_feat(feat_item, None, d_in, d_pad, n_i_rows)
    fu_nbr = _pad_feat(feat_user, inv_u, d_in, d_pad, n_u_k)   # D_u^{-1/2} [F_user, 1]
    fi_nbr = _pad_feat(feat_item, inv_i, d_in, d_pad, n_i_k)   # D_i^{-1/2} [F_item, 1]

    inv_u_col = jnp.zeros((n_u_rows, 1), jnp.float32).at[:n_users, 0].set(inv_u)
    inv_i_col = jnp.zeros((n_i_rows, 1), jnp.float32).at[:n_items, 0].set(inv_i)

    w1f = _fused_weight(w1t, b1, d_in, d_pad, d_out, d_out_pad)
    w2f = _fused_weight(w2t, b2, d_in, d_pad, d_out, d_out_pad)

    h_user = ngcf_ntype_forward(adj_u, fi_nbr, fu_self, inv_u_col, w1f, w2f, tm=tm_u, tk=tk_i)
    h_item = ngcf_ntype_forward(adj_i, fu_nbr, fi_self, inv_i_col, w1f, w2f, tm=tm_i, tk=tk_u)

    return {"user": h_user[:n_users, :d_out], "item": h_item[:n_items, :d_out]}


# -------------------------------------------------------------------------- reference


def _reference_forward(feat_user, feat_item, adj_ui, params):
    """Pure-JAX reference mirroring the PyTorch module (eval mode)."""
    w1t, b1, w2t, b2 = params

    def one(adj_norm, f_other, f_self):
        agg = adj_norm @ f_other
        deg = jnp.sum(adj_norm, axis=-1, keepdims=True)
        h = (f_self + agg) @ w1t + (agg * f_self) @ w2t + b1 + deg * (b1 + b2)
        h = jnp.where(h > 0, h, 0.2 * h)
        n = jnp.sqrt(jnp.sum(h * h, axis=-1, keepdims=True))
        return h / jnp.maximum(n, 1e-12)

    adj = adj_ui.astype(jnp.float32)
    deg_u = jnp.sum(adj, axis=1)
    deg_i = jnp.sum(adj, axis=0)
    iu = jnp.where(deg_u > 0, 1.0 / jnp.sqrt(jnp.maximum(deg_u, 1.0)), 0.0)
    ii = jnp.where(deg_i > 0, 1.0 / jnp.sqrt(jnp.maximum(deg_i, 1.0)), 0.0)
    a = adj * iu[:, None] * ii[None, :]
    return {"user": one(a, feat_item, feat_user),
            "item": one(a.T, feat_user, feat_item)}


if __name__ == "__main__":
    key = jax.random.PRNGKey(0)
    in_size, out_size = 16, 32
    (k_fu, k_fi, k_w1, k_w2, k_adj, k_b1, k_b2,
     k_fu2, k_fi2, k_adj2) = jax.random.split(key, 10)

    # xavier_uniform_ for W1/W2 (torch shape (out, in)); module init sets biases to 0.
    bound = (6.0 / (in_size + out_size)) ** 0.5
    w1 = jax.random.uniform(k_w1, (out_size, in_size), minval=-bound, maxval=bound, dtype=jnp.float32)
    w2 = jax.random.uniform(k_w2, (out_size, in_size), minval=-bound, maxval=bound, dtype=jnp.float32)
    b_zero = jnp.zeros((1, out_size), jnp.float32)
    params_init = (w1.T, b_zero, w2.T, b_zero)          # faithful module init
    b1_rnd = 0.1 * jax.random.normal(k_b1, (1, out_size), dtype=jnp.float32)
    b2_rnd = 0.1 * jax.random.normal(k_b2, (1, out_size), dtype=jnp.float32)
    params_rnd = (w1.T, b1_rnd, w2.T, b2_rnd)           # exercises the bias / deg*(b1+b2) folding

    # case 1: tiny graph, single tile per axis, default tile caps
    n_u1, n_i1 = 8, 16
    fu1 = jax.random.normal(k_fu, (n_u1, in_size), dtype=jnp.float32)
    fi1 = jax.random.normal(k_fi, (n_i1, in_size), dtype=jnp.float32)
    adj1 = (jax.random.uniform(k_adj, (n_u1, n_i1)) < 0.35).astype(jnp.float32)

    # case 2: multi-tile graph with structurally empty K blocks (exercises the scalar-prefetch
    # block-skip schedule and zero-degree destination rows); small tile caps force tiling.
    n_u2, n_i2 = 96, 320
    fu2 = jax.random.normal(k_fu2, (n_u2, in_size), dtype=jnp.float32)
    fi2 = jax.random.normal(k_fi2, (n_i2, in_size), dtype=jnp.float32)
    adj2 = (jax.random.uniform(k_adj2, (n_u2, n_i2)) < 0.3).astype(jnp.float32)
    adj2 = adj2 * (jnp.arange(n_i2)[None, :] < 192).astype(jnp.float32)  # items >= 192: no edges

    cases = [
        (fu1, fi1, adj1, dict()),
        (fu2, fi2, adj2, dict(row_tile_cap=128, k_tile_cap=128)),
    ]
    for fu, fi, adj, caps in cases:
        for params in (params_init, params_rnd):
            out = ngcf_layer_forward(fu, fi, adj, params, **caps)
            out = jax.tree_util.tree_map(jax.block_until_ready, out)
            ref = _reference_forward(fu, fi, adj, params)
            assert out["user"].shape == (fu.shape[0], out_size)
            assert out["item"].shape == (fi.shape[0], out_size)
            assert jnp.allclose(out["user"], ref["user"], atol=2e-5), "user mismatch"
            assert jnp.allclose(out["item"], ref["item"], atol=2e-5), "item mismatch"

    print("KERNEL_OK")
</pallas_src>

<mosaic_0001>
module attributes {stable_mosaic.version = 11 : i64} {
  func.func @_ngcf_kernel(%arg0: i32, %arg1: i32, %arg2: memref<1xi32, #tpu.memory_space<smem>>, %arg3: memref<1xi32, #tpu.memory_space<smem>>, %arg4: memref<128x128xbf16, #tpu.memory_space<vmem>>, %arg5: memref<128x128xf32, #tpu.memory_space<vmem>>, %arg6: memref<128x128xf32, #tpu.memory_space<vmem>>, %arg7: memref<128x1xf32, #tpu.memory_space<vmem>>, %arg8: memref<128x128xf32, #tpu.memory_space<vmem>>, %arg9: memref<128x128xf32, #tpu.memory_space<vmem>>, %arg10: memref<128x128xf32, #tpu.memory_space<vmem>>, %arg11: memref<128x128xf32, #tpu.memory_space<vmem>>) attributes {dimension_semantics = [#tpu.dimension_semantics<parallel>, #tpu.dimension_semantics<arbitrary>], iteration_bounds = array<i64: 1, 1>, scalar_prefetch = 2 : i64, scratch_operands = 1 : i64, tpu.core_type = #tpu.core_type<tc>, window_params = [{transform_indices = @transform_0, window_bounds = array<i64: 128, 128>}, {transform_indices = @transform_1, window_bounds = array<i64: 128, 128>}, {transform_indices = @transform_2, window_bounds = array<i64: 128, 128>}, {transform_indices = @transform_3, window_bounds = array<i64: 128, 1>}, {pipeline_mode = #tpu.pipeline_mode<synchronous>, transform_indices = @transform_4, window_bounds = array<i64: 128, 128>}, {pipeline_mode = #tpu.pipeline_mode<synchronous>, transform_indices = @transform_5, window_bounds = array<i64: 128, 128>}, {transform_indices = @transform_6, window_bounds = array<i64: 128, 128>}]} {
    %c0_i32 = arith.constant 0 : i32
    %0 = arith.cmpi eq, %arg1, %c0_i32 : i32
    %1 = arith.extui %0 : i1 to i32
    %c0_i32_0 = arith.constant 0 : i32
    %2 = arith.cmpi ne, %1, %c0_i32_0 : i32
    scf.if %2 {
      %cst = arith.constant 0.000000e+00 : f32
      %11 = vector.broadcast %cst : f32 to vector<128x128xf32>
      %c0 = arith.constant 0 : index
      %c0_4 = arith.constant 0 : index
      %12 = vector.load %arg11[%c0, %c0_4] : memref<128x128xf32, #tpu.memory_space<vmem>>, vector<128x128xf32>
      tpu.vector_store %arg11[%c0, %c0_4], %11 {strides = array<i32>} : memref<128x128xf32, #tpu.memory_space<vmem>>, vector<128x128xf32>,
    } else {
    }
    %3 = arith.index_cast %arg0 : i32 to index
    %4 = memref.load %arg3[%3] : memref<1xi32, #tpu.memory_space<smem>>
    %5 = arith.cmpi slt, %arg1, %4 : i32
    %6 = arith.extui %5 : i1 to i32
    %c0_i32_1 = arith.constant 0 : i32
    %7 = arith.cmpi ne, %6, %c0_i32_1 : i32
    scf.if %7 {
      %c0 = arith.constant 0 : index
      %c0_4 = arith.constant 0 : index
      %11 = vector.load %arg11[%c0, %c0_4] : memref<128x128xf32, #tpu.memory_space<vmem>>, vector<128x128xf32>
      %c0_5 = arith.constant 0 : index
      %c0_6 = arith.constant 0 : index
      %12 = vector.load %arg4[%c0_5, %c0_6] : memref<128x128xbf16, #tpu.memory_space<vmem>>, vector<128x128xbf16>
      %13 = arith.extf %12 : vector<128x128xbf16> to vector<128x128xf32>
      %c0_7 = arith.constant 0 : index
      %c0_8 = arith.constant 0 : index
      %14 = vector.load %arg5[%c0_7, %c0_8] : memref<128x128xf32, #tpu.memory_space<vmem>>, vector<128x128xf32>
      %cst = arith.constant dense<0.000000e+00> : vector<128x128xf32>
      %15 = tpu.matmul %13, %14, %cst {dimension_numbers = #tpu.dot_dimension_numbers<[1], [0], [0], [1], [0, 0, 1, 1], [], []>} : vector<128x128xf32>, vector<128x128xf32>, vector<128x128xf32> -> vector<128x128xf32>
      %16 = arith.addf %11, %15 : vector<128x128xf32>
      %c0_9 = arith.constant 0 : index
      %c0_10 = arith.constant 0 : index
      %17 = vector.load %arg11[%c0_9, %c0_10] : memref<128x128xf32, #tpu.memory_space<vmem>>, vector<128x128xf32>
      tpu.vector_store %arg11[%c0_9, %c0_10], %16 {strides = array<i32>} : memref<128x128xf32, #tpu.memory_space<vmem>>, vector<128x128xf32>,
    } else {
    }
    %c0_i32_2 = arith.constant 0 : i32
    %8 = arith.cmpi eq, %arg1, %c0_i32_2 : i32
    %9 = arith.extui %8 : i1 to i32
    %c0_i32_3 = arith.constant 0 : i32
    %10 = arith.cmpi ne, %9, %c0_i32_3 : i32
    scf.if %10 {
      %c0 = arith.constant 0 : index
      %c0_4 = arith.constant 0 : index
      %11 = vector.load %arg6[%c0, %c0_4] : memref<128x128xf32, #tpu.memory_space<vmem>>, vector<128x128xf32>
      %c0_5 = arith.constant 0 : index
      %c0_6 = arith.constant 0 : index
      %12 = vector.load %arg11[%c0_5, %c0_6] : memref<128x128xf32, #tpu.memory_space<vmem>>, vector<128x128xf32>
      %c0_7 = arith.constant 0 : index
      %c0_8 = arith.constant 0 : index
      %13 = vector.load %arg7[%c0_7, %c0_8] : memref<128x1xf32, #tpu.memory_space<vmem>>, vector<128x1xf32>
      %14 = vector.broadcast %13 : vector<128x1xf32> to vector<128x128xf32>
      %15 = arith.mulf %12, %14 : vector<128x128xf32>
      %16 = arith.addf %11, %15 : vector<128x128xf32>
      %c0_9 = arith.constant 0 : index
      %c0_10 = arith.constant 0 : index
      %17 = vector.load %arg8[%c0_9, %c0_10] : memref<128x128xf32, #tpu.memory_space<vmem>>, vector<128x128xf32>
      %cst = arith.constant dense<0.000000e+00> : vector<128x128xf32>
      %18 = tpu.matmul %16, %17, %cst {dimension_numbers = #tpu.dot_dimension_numbers<[1], [0], [0], [1], [0, 0, 1, 1], [], []>} : vector<128x128xf32>, vector<128x128xf32>, vector<128x128xf32> -> vector<128x128xf32>
      %19 = arith.mulf %15, %11 : vector<128x128xf32>
      %c0_11 = arith.constant 0 : index
      %c0_12 = arith.constant 0 : index
      %20 = vector.load %arg9[%c0_11, %c0_12] : memref<128x128xf32, #tpu.memory_space<vmem>>, vector<128x128xf32>
      %cst_13 = arith.constant dense<0.000000e+00> : vector<128x128xf32>
      %21 = tpu.matmul %19, %20, %cst_13 {dimension_numbers = #tpu.dot_dimension_numbers<[1], [0], [0], [1], [0, 0, 1, 1], [], []>} : vector<128x128xf32>, vector<128x128xf32>, vector<128x128xf32> -> vector<128x128xf32>
      %22 = arith.addf %18, %21 : vector<128x128xf32>
      %cst_14 = arith.constant 0.000000e+00 : f32
      %23 = vector.broadcast %cst_14 : f32 to vector<128x128xf32>
      %24 = arith.cmpf ogt, %22, %23 : vector<128x128xf32>
      %cst_15 = arith.constant 2.000000e-01 : f32
      %25 = vector.broadcast %cst_15 : f32 to vector<128x128xf32>
      %26 = arith.mulf %25, %22 : vector<128x128xf32>
      %27 = arith.select %24, %22, %26 : vector<128x128xi1>, vector<128x128xf32>
      %28 = arith.mulf %27, %27 : vector<128x128xf32>
      %cst_16 = arith.constant dense<0.000000e+00> : vector<128xf32>
      %29 = vector.multi_reduction <add>, %28, %cst_16 [1] : vector<128x128xf32> to vector<128xf32>
      %30 = vector.shape_cast %29 : vector<128xf32> to vector<128x1xf32>
      %cst_17 = arith.constant 1.000000e-24 : f32
      %31 = vector.broadcast %cst_17 : f32 to vector<128x1xf32>
      %32 = arith.maximumf %30, %31 : vector<128x1xf32>
      %33 = math.rsqrt %32 : vector<128x1xf32>
      %34 = vector.broadcast %33 : vector<128x1xf32> to vector<128x128xf32>
      %35 = arith.mulf %27, %34 : vector<128x128xf32>
      %c0_18 = arith.constant 0 : index
      %c0_19 = arith.constant 0 : index
      %36 = vector.load %arg10[%c0_18, %c0_19] : memref<128x128xf32, #tpu.memory_space<vmem>>, vector<128x128xf32>
      tpu.vector_store %arg10[%c0_18, %c0_19], %35 {strides = array<i32>} : memref<128x128xf32, #tpu.memory_space<vmem>>, vector<128x128xf32>,
    } else {
    }
    return
  }
  func.func @transform_0(%arg0: i32, %arg1: i32, %arg2: memref<1xi32, #tpu.memory_space<smem>>, %arg3: memref<1xi32, #tpu.memory_space<smem>>) -> (i32, i32) {
    %c1_i32 = arith.constant 1 : i32
    %0 = arith.muli %arg0, %c1_i32 : i32
    %1 = arith.addi %0, %arg1 : i32
    %2 = arith.index_cast %1 : i32 to index
    %3 = memref.load %arg2[%2] : memref<1xi32, #tpu.memory_space<smem>>
    %c0_i32 = arith.constant 0 : i32
    return %arg0, %3 : i32, i32
  }
  func.func @transform_1(%arg0: i32, %arg1: i32, %arg2: memref<1xi32, #tpu.memory_space<smem>>, %arg3: memref<1xi32, #tpu.memory_space<smem>>) -> (i32, i32) {
    %c1_i32 = arith.constant 1 : i32
    %0 = arith.muli %arg0, %c1_i32 : i32
    %1 = arith.addi %0, %arg1 : i32
    %2 = arith.index_cast %1 : i32 to index
    %3 = memref.load %arg2[%2] : memref<1xi32, #tpu.memory_space<smem>>
    %c0_i32 = arith.constant 0 : i32
    %c0_i32_0 = arith.constant 0 : i32
    return %3, %c0_i32 : i32, i32
  }
  func.func @transform_2(%arg0: i32, %arg1: i32, %arg2: memref<1xi32, #tpu.memory_space<smem>>, %arg3: memref<1xi32, #tpu.memory_space<smem>>) -> (i32, i32) {
    %c0_i32 = arith.constant 0 : i32
    %c0_i32_0 = arith.constant 0 : i32
    return %arg0, %c0_i32 : i32, i32
  }
  func.func @transform_3(%arg0: i32, %arg1: i32, %arg2: memref<1xi32, #tpu.memory_space<smem>>, %arg3: memref<1xi32, #tpu.memory_space<smem>>) -> (i32, i32) {
    %c0_i32 = arith.constant 0 : i32
    %c0_i32_0 = arith.constant 0 : i32
    return %arg0, %c0_i32 : i32, i32
  }
  func.func @transform_4(%arg0: i32, %arg1: i32, %arg2: memref<1xi32, #tpu.memory_space<smem>>, %arg3: memref<1xi32, #tpu.memory_space<smem>>) -> (i32, i32) {
    %c0_i32 = arith.constant 0 : i32
    %c0_i32_0 = arith.constant 0 : i32
    %c0_i32_1 = arith.constant 0 : i32
    return %c0_i32, %c0_i32_0 : i32, i32
  }
  func.func @transform_5(%arg0: i32, %arg1: i32, %arg2: memref<1xi32, #tpu.memory_space<smem>>, %arg3: memref<1xi32, #tpu.memory_space<smem>>) -> (i32, i32) {
    %c0_i32 = arith.constant 0 : i32
    %c0_i32_0 = arith.constant 0 : i32
    %c0_i32_1 = arith.constant 0 : i32
    return %c0_i32, %c0_i32_0 : i32, i32
  }
  func.func @transform_6(%arg0: i32, %arg1: i32, %arg2: memref<1xi32, #tpu.memory_space<smem>>, %arg3: memref<1xi32, #tpu.memory_space<smem>>) -> (i32, i32) {
    %c0_i32 = arith.constant 0 : i32
    %c0_i32_0 = arith.constant 0 : i32
    return %arg0, %c0_i32 : i32, i32
  }
}

</mosaic_0001>

<bundles_post_ra>
// kernel: ngcf_layer_forward.3
= control target key start
LH: loop header
LB: loop body
LE: loop exit
PB: predicated region body
PF: predicated region fallthrough
CT: control target
= control target key end

     0   :  { %v1491_v0 = vmov 0.0   ;;  %s1908_s0 = inlined_call_operand.<no memory space> [shape: s32[1], index: 0, kind: input, shape index: {}]   ;;  %s1909_s1 = inlined_call_operand.<no memory space> [shape: s32[1], index: 1, kind: input, shape index: {}]   ;;  %s1910_s4 = inlined_call_operand.vmem [shape: f32[128,128], index: 4, kind: input, shape index: {}]   ;;  %s1911_s5 = inlined_call_operand.vmem [shape: f32[128,1], index: 5, kind: input, shape index: {}]   ;;  %s1912_s6 = inlined_call_operand.vmem [shape: f32[128,128], index: 6, kind: input, shape index: {}]   ;;  %s1913_s7 = inlined_call_operand.vmem [shape: f32[128,128], index: 7, kind: input, shape index: {}]   ;;  %s1914_s8 = inlined_call_operand.vmem [shape: f32[128,128], index: 8, kind: output, shape index: {}]   ;;  %s1915_s2 = inlined_call_operand.vmem [shape: bf16[128,128], index: 2, kind: input, shape index: {}]   ;;  %s1916_s3 = inlined_call_operand.vmem [shape: f32[128,128], index: 3, kind: input, shape index: {}]  }
   0x1   :  { %p60_p0 = scmp.lt.s32.totalorder %s1908_s0, 0  ;;  %s1020_s9 = sshll.u32 %s1908_s0, 4  ;;  %80 = vst [vmem:[#allocation2] sm:$0xff] %v1491_v0  ;;  %81 = vst [vmem:[#allocation2 + $0x8] sm:$0xff] %v1491_v0 }
   0x2   :  { %82 = vst [vmem:[#allocation2 + $0x10] sm:$0xff] %v1491_v0  ;;  %83 = vst [vmem:[#allocation2 + $0x18] sm:$0xff] %v1491_v0  ;;  %p69_p1 = scmp.lt.s32.totalorder %s1020_s9, 15  ;;  %p1023_p2 = scmp.le.s32.totalorder %s1909_s1, 0 }
   0x3   :  { %84 = vst [vmem:[#allocation2 + $0x20] sm:$0xff] %v1491_v0  ;;  %85 = vst [vmem:[#allocation2 + $0x28] sm:$0xff] %v1491_v0  ;;  %s1918_s0 = smov (!%p60_p0, %s1908_s0), 0 }
   0x4   :  { %86 = vst [vmem:[#allocation2 + $0x30] sm:$0xff] %v1491_v0  ;;  %87 = vst [vmem:[#allocation2 + $0x38] sm:$0xff] %v1491_v0  ;;  %s1920_s9 = smov (!%p69_p1, %s1020_s9), 15  ;;  %s1019_s14 = sshll.u32 %s1918_s0, 2 }
   0x5   :  { %88 = vst [vmem:[#allocation2 + $0x40] sm:$0xff] %v1491_v0  ;;  %89 = vst [vmem:[#allocation2 + $0x48] sm:$0xff] %v1491_v0  ;;  %s1554_s17 = scalar_lea.vmem %s1915_s2, %s1019_s14  ;;  %s1021_s18 = sshll.u32 %s1920_s9, 3 }
   0x6   :  { %90 = vst [vmem:[#allocation2 + $0x50] sm:$0xff] %v1491_v0  ;;  %91 = vst [vmem:[#allocation2 + $0x58] sm:$0xff] %v1491_v0  ;;  %s1559_s21 = scalar_lea.vmem %s1916_s3, %s1021_s18  ;;  %100 = sbr.rel (%p1023_p2) target bundleno = 270 (0x10e), region = 33  ;;  %v1025_v10 = vld [vmem:[%s1554_s17] sm:$0xff] (!%p1023_p2)   ;;  %v1056_v29 = vld [vmem:[%s1554_s17 + $0x8] sm:$0xff] (!%p1023_p2)  }
   0x7   :  { %92 = vst [vmem:[#allocation2 + $0x60] sm:$0xff] %v1491_v0  ;;  %93 = vst [vmem:[#allocation2 + $0x68] sm:$0xff] %v1491_v0  ;;  %v149_v1 = vld [vmem:[%s1559_s21] sm:$0xff] (!%p1023_p2)  ;;  %v150_v2 = vld [vmem:[%s1559_s21 + $0x8] sm:$0xff] (!%p1023_p2)  ;;  %v1026_v14 = vunpack.c.l.bf16 (!%p1023_p2), %v1025_v10  ;;  %v1027_v31 = vunpack.c.h.bf16 (!%p1023_p2), %v1025_v10  ;;  %v1030_v33 = vunpack.c.l.bf16 (!%p1023_p2), %v1056_v29  ;;  %v1031_v37 = vunpack.c.h.bf16 (!%p1023_p2), %v1056_v29 }
   0x8   :  { %94 = vst [vmem:[#allocation2 + $0x70] sm:$0xff] %v1491_v0  ;;  %95 = vst [vmem:[#allocation2 + $0x78] sm:$0xff] %v1491_v0  ;;  %v151_v3 = vld [vmem:[%s1559_s21 + $0x10] sm:$0xff] (!%p1023_p2)  ;;  %v1327_v4 = vpack.c.bf16 (!%p1023_p2), %v150_v2, %v149_v1  ;;  %v152_v5 = vld [vmem:[%s1559_s21 + $0x18] sm:$0xff] (!%p1023_p2) }
   0x9   :  { %v1331_v6 = vpack.c.bf16 (!%p1023_p2), %v152_v5, %v151_v3  ;;  %v153_v7 = vld [vmem:[%s1559_s21 + $0x20] sm:$0xff] (!%p1023_p2)  ;;  %v154_v8 = vld [vmem:[%s1559_s21 + $0x28] sm:$0xff] (!%p1023_p2)  ;;  %v155_v12 = vld [vmem:[%s1559_s21 + $0x30] sm:$0xff] (!%p1023_p2)  ;;  %1191 = vmatprep.mubr.f32.mxu0 (!%p1023_p2), %v1026_v14 }
   0xa   :  { %1328 = vmatprep.subr.bf16.mxu0 (!%p1023_p2), %v1327_v4  ;;  %1423 = vmatprep.subr.bf16.mxu1 (!%p1023_p2), %v1327_v4  ;;  %v1335_v9 = vpack.c.bf16 (!%p1023_p2), %v154_v8, %v153_v7  ;;  %v1059_v11 = vld [vmem:[%s1554_s17 + $0x20] sm:$0xff] (!%p1023_p2)   ;;  %v156_v13 = vld [vmem:[%s1559_s21 + $0x38] sm:$0xff] (!%p1023_p2)  ;;  %v158_v18 = vld [vmem:[%s1559_s21 + $0x48] sm:$0xff] (!%p1023_p2) }
   0xb   :  { %1330 = vmatpush3.bf16.msra.mxu0 (!%p1023_p2), %v1327_v4  ;;  %1431 = vmatpush3.bf16.msra.mxu1 (!%p1023_p2), %v1327_v4  ;;  %v1042_v15 = vunpack.c.l.bf16 (!%p1023_p2), %v1059_v11  ;;  %v1339_v16 = vpack.c.bf16 (!%p1023_p2), %v156_v13, %v155_v12  ;;  %v157_v17 = vld [vmem:[%s1559_s21 + $0x40] sm:$0xff] (!%p1023_p2)  ;;  %v159_v20 = vld [vmem:[%s1559_s21 + $0x50] sm:$0xff] (!%p1023_p2)  ;;  %v160_v21 = vld [vmem:[%s1559_s21 + $0x58] sm:$0xff] (!%p1023_p2)  ;;  %v1043_v32 = vunpack.c.h.bf16 (!%p1023_p2), %v1059_v11 }
   0xc   :  { %1332 = vmatprep.subr.bf16.mxu0 (!%p1023_p2), %v1331_v6  ;;  %1424 = vmatprep.subr.bf16.mxu1 (!%p1023_p2), %v1331_v6  ;;  %v1343_v19 = vpack.c.bf16 (!%p1023_p2), %v158_v18, %v157_v17  ;;  %v1347_v22 = vpack.c.bf16 (!%p1023_p2), %v160_v21, %v159_v20  ;;  %v161_v23 = vld [vmem:[%s1559_s21 + $0x60] sm:$0xff] (!%p1023_p2)  ;;  %v162_v24 = vld [vmem:[%s1559_s21 + $0x68] sm:$0xff] (!%p1023_p2)  ;;  %v163_v26 = vld [vmem:[%s1559_s21 + $0x70] sm:$0xff] (!%p1023_p2) }
   0xd   :  { %1203 = vmatprep.mubr.f32.mxu1 %v1042_v15  ;;  %v1351_v25 = vpack.c.bf16 %v162_v24, %v161_v23  ;;  %v164_v27 = vld [vmem:[%s1559_s21 + $0x78] sm:$0xff]  ;;  %v1060_v30 = vld [vmem:[%s1554_s17 + $0x28] sm:$0xff]   ;;  %v1057_v35 = vld [vmem:[%s1554_s17 + $0x10] sm:$0xff]  }
   0xe   :  { %v1355_v28 = vpack.c.bf16 %v164_v27, %v163_v26  ;;  %v1046_v34 = vunpack.c.l.bf16 %v1060_v30  ;;  %v1061_v36 = vld [vmem:[%s1554_s17 + $0x30] sm:$0xff]   ;;  %v1047_v38 = vunpack.c.h.bf16 %v1060_v30  ;;  %v1034_v39 = vunpack.c.l.bf16 %v1057_v35  ;;  %v1058_v41 = vld [vmem:[%s1554_s17 + $0x18] sm:$0xff]   ;;  %v102_v49 = vld [vmem:[#allocation2 + $0x8] sm:$0xff] }
   0xf   :  { %1334 = vmatpush3.bf16.msra.mxu0 %v1331_v6  ;;  %1432 = vmatpush3.bf16.msra.mxu1 %v1331_v6  ;;  %v1050_v40 = vunpack.c.l.bf16 %v1061_v36  ;;  %v1062_v42 = vld [vmem:[%s1554_s17 + $0x38] sm:$0xff]   ;;  %v1035_v43 = vunpack.c.h.bf16 %v1057_v35  ;;  %v1051_v44 = vunpack.c.h.bf16 %v1061_v36  ;;  %v1038_v45 = vunpack.c.l.bf16 %v1058_v41  ;;  %v110_v50 = vld [vmem:[#allocation2 + $0x48] sm:$0xff]  ;;  %v101_v51 = vld [vmem:[#allocation2] sm:$0xff] }
  0x10   :  { %1336 = vmatprep.subr.bf16.mxu0 %v1335_v9  ;;  %1425 = vmatprep.subr.bf16.mxu1 %v1335_v9  ;;  %v1054_v46 = vunpack.c.l.bf16 %v1062_v42  ;;  %v1039_v47 = vunpack.c.h.bf16 %v1058_v41  ;;  %v1055_v48 = vunpack.c.h.bf16 %v1062_v42  ;;  %v109_v52 = vld [vmem:[#allocation2 + $0x40] sm:$0xff]  ;;  %v104_v61 = vld [vmem:[#allocation2 + $0x18] sm:$0xff]  ;;  %v103_v63 = vld [vmem:[#allocation2 + $0x10] sm:$0xff] }
  0x11   :  { %v112_v62 = vld [vmem:[#allocation2 + $0x58] sm:$0xff]  ;;  %v111_v0 = vld [vmem:[#allocation2 + $0x50] sm:$0xff]  ;;  %v114_v10 = vld [vmem:[#allocation2 + $0x68] sm:$0xff] }
  0x12   :  { %v105_v11 = vld [vmem:[#allocation2 + $0x20] sm:$0xff]  ;;  %v108_v21 = vld [vmem:[#allocation2 + $0x38] sm:$0xff]  ;;  %v107_v23 = vld [vmem:[#allocation2 + $0x30] sm:$0xff] }
  0x13   :  { %1338 = vmatpush3.bf16.msra.mxu0 %v1335_v9  ;;  %1433 = vmatpush3.bf16.msra.mxu1 %v1335_v9  ;;  %v106_v9 = vld [vmem:[#allocation2 + $0x28] sm:$0xff]  ;;  %v113_v12 = vld [vmem:[#allocation2 + $0x60] sm:$0xff]  ;;  %v115_v24 = vld [vmem:[#allocation2 + $0x70] sm:$0xff] }
  0x14   :  { %1340 = vmatprep.subr.bf16.mxu0 %v1339_v16  ;;  %1426 = vmatprep.subr.bf16.mxu1 %v1339_v16 }
  0x17   :  { %1342 = vmatpush3.bf16.msra.mxu0 %v1339_v16  ;;  %1434 = vmatpush3.bf16.msra.mxu1 %v1339_v16 }
  0x18   :  { %1344 = vmatprep.subr.bf16.mxu0 %v1343_v19  ;;  %1427 = vmatprep.subr.bf16.mxu1 %v1343_v19 }
  0x1b   :  { %1346 = vmatpush3.bf16.msra.mxu0 %v1343_v19  ;;  %1435 = vmatpush3.bf16.msra.mxu1 %v1343_v19 }
  0x1c   :  { %1348 = vmatprep.subr.bf16.mxu0 %v1347_v22  ;;  %1428 = vmatprep.subr.bf16.mxu1 %v1347_v22 }
  0x1f   :  { %1350 = vmatpush3.bf16.msra.mxu0 %v1347_v22  ;;  %1436 = vmatpush3.bf16.msra.mxu1 %v1347_v22  ;;  %v116_v22 = vld [vmem:[#allocation2 + $0x78] sm:$0xff] }
  0x20   :  { %1352 = vmatprep.subr.bf16.mxu0 %v1351_v25  ;;  %1429 = vmatprep.subr.bf16.mxu1 %v1351_v25 }
  0x23   :  { %1354 = vmatpush3.bf16.msra.mxu0 %v1351_v25  ;;  %1437 = vmatpush3.bf16.msra.mxu1 %v1351_v25 }
  0x24   :  { %1356 = vmatprep.subr.bf16.mxu0 %v1355_v28  ;;  %1430 = vmatprep.subr.bf16.mxu1 %v1355_v28 }
  0x27   :  { %1358 = vmatpush3.bf16.msra.mxu0 %v1355_v28  ;;  %1438 = vmatpush3.bf16.msra.mxu1 %v1355_v28 }
  0x2a   :  { %1192 = vmatmul.mubr.f32.vlgmr.msra.gmra.mrb[0].mxu0 %v1027_v31  ;;  %1204 = vmatmul.mubr.f32.vlgmr.msra.gmra.mrb[0].mxu1 %v1043_v32 }
  0x2b   :  { %1194 = vmatprep.mubr.f32.mxu0 %v1030_v33  ;;  %1206 = vmatprep.mubr.f32.mxu1 %v1046_v34 }
  0x2e   :  { %1195 = vmatmul.mubr.f32.gmra.mrb[2].mxu0 %v1031_v37  ;;  %1207 = vmatmul.mubr.f32.gmra.mrb[2].mxu1 %v1047_v38 }
  0x2f   :  { %1197 = vmatprep.mubr.f32.mxu0 %v1034_v39  ;;  %1209 = vmatprep.mubr.f32.mxu1 %v1050_v40 }
  0x32   :  { %1198 = vmatmul.mubr.f32.gmra.mrb[4].mxu0 %v1035_v43  ;;  %1210 = vmatmul.mubr.f32.gmra.mrb[4].mxu1 %v1051_v44 }
  0x33   :  { %1200 = vmatprep.mubr.f32.mxu0 %v1038_v45  ;;  %1212 = vmatprep.mubr.f32.mxu1 %v1054_v46 }
  0x36   :  { %1201 = vmatmul.mubr.f32.gmra.mrb[6].mxu0 %v1039_v47  ;;  %1213 = vmatmul.mubr.f32.gmra.mrb[6].mxu1 %v1055_v48 }
  0xfd   :  { %v1193_v53 = vpop.f32.mrb[0].mxu0  ;;  %v1205_v54 = vpop.f32.mrb[0].mxu1 }
  0xfe   :  { %v311_v55 = vadd.f32 %v1193_v53, %v102_v49  ;;  %v319_v56 = vadd.f32 %v1205_v54, %v110_v50  ;;  %v231_v57 = vpop.f32.mrb[1].mxu0  ;;  %v271_v58 = vpop.f32.mrb[1].mxu1 }
  0xff   :  { %v310_v59 = vadd.f32 %v231_v57, %v101_v51  ;;  %v318_v60 = vadd.f32 %v271_v58, %v109_v52 }
 0x100   :  { %327 = vst [vmem:[#allocation2 + $0x8] sm:$0xff] %v311_v55  ;;  %335 = vst [vmem:[#allocation2 + $0x48] sm:$0xff] %v319_v56 }
 0x101   :  { %326 = vst [vmem:[#allocation2] sm:$0xff] %v310_v59  ;;  %334 = vst [vmem:[#allocation2 + $0x40] sm:$0xff] %v318_v60  ;;  %v1196_v1 = vpop.f32.mrb[2].mxu0  ;;  %v1208_v2 = vpop.f32.mrb[2].mxu1 }
 0x102   :  { %v313_v3 = vadd.f32 %v1196_v1, %v104_v61  ;;  %v321_v4 = vadd.f32 %v1208_v2, %v112_v62  ;;  %v241_v5 = vpop.f32.mrb[3].mxu0  ;;  %v281_v6 = vpop.f32.mrb[3].mxu1 }
 0x103   :  { %v312_v7 = vadd.f32 %v241_v5, %v103_v63  ;;  %v320_v8 = vadd.f32 %v281_v6, %v111_v0 }
 0x104   :  { %329 = vst [vmem:[#allocation2 + $0x18] sm:$0xff] %v313_v3  ;;  %337 = vst [vmem:[#allocation2 + $0x58] sm:$0xff] %v321_v4 }
 0x105   :  { %328 = vst [vmem:[#allocation2 + $0x10] sm:$0xff] %v312_v7  ;;  %336 = vst [vmem:[#allocation2 + $0x50] sm:$0xff] %v320_v8  ;;  %v1199_v13 = vpop.f32.mrb[4].mxu0  ;;  %v1211_v14 = vpop.f32.mrb[4].mxu1 }
 0x106   :  { %v315_v15 = vadd.f32 %v1199_v13, %v106_v9  ;;  %v323_v16 = vadd.f32 %v1211_v14, %v114_v10  ;;  %v251_v17 = vpop.f32.mrb[5].mxu0  ;;  %v291_v18 = vpop.f32.mrb[5].mxu1 }
 0x107   :  { %v314_v19 = vadd.f32 %v251_v17, %v105_v11  ;;  %v322_v20 = vadd.f32 %v291_v18, %v113_v12 }
 0x108   :  { %331 = vst [vmem:[#allocation2 + $0x28] sm:$0xff] %v315_v15  ;;  %339 = vst [vmem:[#allocation2 + $0x68] sm:$0xff] %v323_v16 }
 0x109   :  { %330 = vst [vmem:[#allocation2 + $0x20] sm:$0xff] %v314_v19  ;;  %338 = vst [vmem:[#allocation2 + $0x60] sm:$0xff] %v322_v20  ;;  %v1202_v25 = vpop.f32.mrb[6].mxu0  ;;  %v1214_v26 = vpop.f32.mrb[6].mxu1 }
 0x10a   :  { %v317_v27 = vadd.f32 %v1202_v25, %v108_v21  ;;  %v325_v28 = vadd.f32 %v1214_v26, %v116_v22  ;;  %v261_v29 = vpop.f32.mrb[7].mxu0  ;;  %v301_v30 = vpop.f32.mrb[7].mxu1 }
 0x10b   :  { %v316_v31 = vadd.f32 %v261_v29, %v107_v23  ;;  %v324_v32 = vadd.f32 %v301_v30, %v115_v24 }
 0x10c   :  { %333 = vst [vmem:[#allocation2 + $0x38] sm:$0xff] %v317_v27  ;;  %341 = vst [vmem:[#allocation2 + $0x78] sm:$0xff] %v325_v28 }
 0x10d   :  { %332 = vst [vmem:[#allocation2 + $0x30] sm:$0xff] %v316_v31  ;;  %340 = vst [vmem:[#allocation2 + $0x70] sm:$0xff] %v324_v32 }
 0x10e PF:  { %v379_v33 = vld [vmem:[%s1911_s5 + $0x10] sm:$0xff]  ;;  %v377_v34 = vld [vmem:[%s1911_s5] sm:$0xff]  ;;  %v1492_v35 = vmov 0   ;;  %v380_v36 = vld [vmem:[%s1911_s5 + $0x18] sm:$0xff] }
 0x10f   :  { %1458 = vset.pattern.permute.xlu1 %v1492_v35  ;;  %1457 = vset.pattern.permute.xlu0 %v1492_v35  ;;  %v378_v37 = vld [vmem:[%s1911_s5 + $0x8] sm:$0xff]  ;;  %v381_v39 = vld [vmem:[%s1911_s5 + $0x20] sm:$0xff]  ;;  %v539_v45 = vld [vmem:[%s1913_s7 + $0x10] sm:$0xff] }
 0x110   :  { %405 = vperm.xlu1 %1458, %v379_v33   ;;  %395 = vperm.xlu0 %1457, %v377_v34   ;;  %v382_v38 = vld [vmem:[%s1911_s5 + $0x28] sm:$0xff]  ;;  %v537_v40 = vld [vmem:[%s1913_s7] sm:$0xff]  ;;  %v540_v47 = vld [vmem:[%s1913_s7 + $0x18] sm:$0xff] }
 0x111   :  { %v538_v41 = vld [vmem:[%s1913_s7 + $0x8] sm:$0xff]  ;;  %v505_v43 = vld [vmem:[%s1912_s6] sm:$0xff]  ;;  %v507_v48 = vld [vmem:[%s1912_s6 + $0x10] sm:$0xff]  ;;  %v1363_v50 = vpack.c.bf16 %v540_v47, %v539_v45 }
 0x112   :  { %v1359_v42 = vpack.c.bf16 %v538_v41, %v537_v40  ;;  %v506_v44 = vld [vmem:[%s1912_s6 + $0x8] sm:$0xff]  ;;  %v508_v49 = vld [vmem:[%s1912_s6 + $0x18] sm:$0xff]  ;;  %v541_v52 = vld [vmem:[%s1913_s7 + $0x20] sm:$0xff] }
 0x113   :  { %v1391_v46 = vpack.c.bf16 %v506_v44, %v505_v43  ;;  %v1395_v51 = vpack.c.bf16 %v508_v49, %v507_v48  ;;  %v542_v53 = vld [vmem:[%s1913_s7 + $0x28] sm:$0xff]  ;;  %v509_v54 = vld [vmem:[%s1912_s6 + $0x20] sm:$0xff]  ;;  %v384_v56 = vld [vmem:[%s1911_s5 + $0x38] sm:$0xff] }
 0x114   :  { %410 = vperm.xlu1 %1458, %v380_v36   ;;  %400 = vperm.xlu0 %1457, %v378_v37   ;;  %v510_v55 = vld [vmem:[%s1912_s6 + $0x28] sm:$0xff]  ;;  %v383_v57 = vld [vmem:[%s1911_s5 + $0x30] sm:$0xff]  ;;  %v1367_v58 = vpack.c.bf16 %v542_v53, %v541_v52  ;;  %v544_v61 = vld [vmem:[%s1913_s7 + $0x38] sm:$0xff] }
 0x115   :  { %1360 = vmatprep.subr.bf16.mxu1 %v1359_v42  ;;  %1392 = vmatprep.subr.bf16.mxu0 %v1391_v46  ;;  %v1399_v59 = vpack.c.bf16 %v510_v55, %v509_v54  ;;  %v543_v60 = vld [vmem:[%s1913_s7 + $0x30] sm:$0xff]  ;;  %v512_v63 = vld [vmem:[%s1912_s6 + $0x38] sm:$0xff]  ;;  %v386_v0 = vld [vmem:[%s1911_s5 + $0x48] sm:$0xff] }
 0x116   :  { %1362 = vmatpush3.bf16.msra.mxu1 %v1359_v42  ;;  %1394 = vmatpush3.bf16.msra.mxu0 %v1391_v46  ;;  %v511_v62 = vld [vmem:[%s1912_s6 + $0x30] sm:$0xff]  ;;  %v385_v1 = vld [vmem:[%s1911_s5 + $0x40] sm:$0xff]  ;;  %v1371_v2 = vpack.c.bf16 %v544_v61, %v543_v60  ;;  %v546_v5 = vld [vmem:[%s1913_s7 + $0x48] sm:$0xff] }
 0x117   :  { %1364 = vmatprep.subr.bf16.mxu1 %v1363_v50  ;;  %1396 = vmatprep.subr.bf16.mxu0 %v1395_v51  ;;  %v1403_v3 = vpack.c.bf16 %v512_v63, %v511_v62  ;;  %v545_v4 = vld [vmem:[%s1913_s7 + $0x40] sm:$0xff]  ;;  %v514_v7 = vld [vmem:[%s1912_s6 + $0x48] sm:$0xff]  ;;  %v388_v8 = vld [vmem:[%s1911_s5 + $0x58] sm:$0xff] }
 0x118   :  { %420 = vperm.xlu1 %1458, %v382_v38   ;;  %415 = vperm.xlu0 %1457, %v381_v39   ;;  %v513_v6 = vld [vmem:[%s1912_s6 + $0x40] sm:$0xff]  ;;  %v387_v9 = vld [vmem:[%s1911_s5 + $0x50] sm:$0xff]  ;;  %v1375_v10 = vpack.c.bf16 %v546_v5, %v545_v4  ;;  %v548_v13 = vld [vmem:[%s1913_s7 + $0x58] sm:$0xff] }
 0x119   :  { %v1407_v11 = vpack.c.bf16 %v514_v7, %v513_v6  ;;  %v547_v12 = vld [vmem:[%s1913_s7 + $0x50] sm:$0xff]  ;;  %v516_v15 = vld [vmem:[%s1912_s6 + $0x58] sm:$0xff]  ;;  %v390_v16 = vld [vmem:[%s1911_s5 + $0x68] sm:$0xff] }
 0x11a   :  { %1366 = vmatpush3.bf16.msra.mxu1 %v1363_v50  ;;  %1398 = vmatpush3.bf16.msra.mxu0 %v1395_v51  ;;  %v515_v14 = vld [vmem:[%s1912_s6 + $0x50] sm:$0xff]  ;;  %v389_v17 = vld [vmem:[%s1911_s5 + $0x60] sm:$0xff]  ;;  %v1379_v18 = vpack.c.bf16 %v548_v13, %v547_v12  ;;  %v550_v21 = vld [vmem:[%s1913_s7 + $0x68] sm:$0xff] }
 0x11b   :  { %1368 = vmatprep.subr.bf16.mxu1 %v1367_v58  ;;  %1400 = vmatprep.subr.bf16.mxu0 %v1399_v59  ;;  %v1411_v19 = vpack.c.bf16 %v516_v15, %v515_v14  ;;  %v549_v20 = vld [vmem:[%s1913_s7 + $0x60] sm:$0xff]  ;;  %v518_v23 = vld [vmem:[%s1912_s6 + $0x68] sm:$0xff]  ;;  %v392_v24 = vld [vmem:[%s1911_s5 + $0x78] sm:$0xff] }
 0x11c   :  { %430 = vperm.xlu1 %1458, %v384_v56   ;;  %425 = vperm.xlu0 %1457, %v383_v57   ;;  %v517_v22 = vld [vmem:[%s1912_s6 + $0x60] sm:$0xff]  ;;  %v391_v25 = vld [vmem:[%s1911_s5 + $0x70] sm:$0xff]  ;;  %v1383_v26 = vpack.c.bf16 %v550_v21, %v549_v20  ;;  %v552_v28 = vld [vmem:[%s1913_s7 + $0x78] sm:$0xff] }
 0x11d   :  { %v551_v27 = vld [vmem:[%s1913_s7 + $0x70] sm:$0xff]  ;;  %v1415_v29 = vpack.c.bf16 %v518_v23, %v517_v22  ;;  %v520_v31 = vld [vmem:[%s1912_s6 + $0x78] sm:$0xff]  ;;  %v361_v34 = vld [vmem:[#allocation2] sm:$0xff] }
 0x11e   :  { %1370 = vmatpush3.bf16.msra.mxu1 %v1367_v58  ;;  %1402 = vmatpush3.bf16.msra.mxu0 %v1399_v59  ;;  %v519_v30 = vld [vmem:[%s1912_s6 + $0x70] sm:$0xff]  ;;  %v1387_v32 = vpack.c.bf16 %v552_v28, %v551_v27  ;;  %v345_v38 = vld [vmem:[%s1910_s4] sm:$0xff]  ;;  %v362_v41 = vld [vmem:[#allocation2 + $0x8] sm:$0xff] }
 0x11f   :  { %1372 = vmatprep.subr.bf16.mxu1 %v1371_v2  ;;  %1404 = vmatprep.subr.bf16.mxu0 %v1403_v3  ;;  %v1419_v33 = vpack.c.bf16 %v520_v31, %v519_v30  ;;  %v363_v35 = vld [vmem:[#allocation2 + $0x10] sm:$0xff]  ;;  %v364_v46 = vld [vmem:[#allocation2 + $0x18] sm:$0xff]  ;;  %v346_v48 = vld [vmem:[%s1910_s4 + $0x8] sm:$0xff] }
 0x120   :  { %440 = vperm.xlu1 %1458, %v386_v0   ;;  %435 = vperm.xlu0 %1457, %v385_v1   ;;  %v347_v42 = vld [vmem:[%s1910_s4 + $0x10] sm:$0xff]  ;;  %v365_v52 = vld [vmem:[#allocation2 + $0x20] sm:$0xff]  ;;  %v366_v56 = vld [vmem:[#allocation2 + $0x28] sm:$0xff] }
 0x121   :  { %v348_v57 = vld [vmem:[%s1910_s4 + $0x18] sm:$0xff]  ;;  %v349_v60 = vld [vmem:[%s1910_s4 + $0x20] sm:$0xff]  ;;  %v367_v63 = vld [vmem:[#allocation2 + $0x30] sm:$0xff] }
 0x122   :  { %1374 = vmatpush3.bf16.msra.mxu1 %v1371_v2  ;;  %1406 = vmatpush3.bf16.msra.mxu0 %v1403_v3  ;;  %v350_v2 = vld [vmem:[%s1910_s4 + $0x28] sm:$0xff]  ;;  %v368_v6 = vld [vmem:[#allocation2 + $0x38] sm:$0xff]  ;;  %v353_v20 = vld [vmem:[%s1910_s4 + $0x40] sm:$0xff] }
 0x123   :  { %1376 = vmatprep.subr.bf16.mxu1 %v1375_v10  ;;  %1408 = vmatprep.subr.bf16.mxu0 %v1407_v11  ;;  %v371_v23 = vld [vmem:[#allocation2 + $0x50] sm:$0xff]  ;;  %v372_v30 = vld [vmem:[#allocation2 + $0x58] sm:$0xff] }
 0x124   :  { %450 = vperm.xlu1 %1458, %v388_v8   ;;  %445 = vperm.xlu0 %1457, %v387_v9   ;;  %v351_v8 = vld [vmem:[%s1910_s4 + $0x30] sm:$0xff] }
 0x126   :  { %1378 = vmatpush3.bf16.msra.mxu1 %v1375_v10  ;;  %1410 = vmatpush3.bf16.msra.mxu0 %v1407_v11  ;;  %v369_v11 = vld [vmem:[#allocation2 + $0x40] sm:$0xff] }
 0x127   :  { %1380 = vmatprep.subr.bf16.mxu1 %v1379_v18  ;;  %1412 = vmatprep.subr.bf16.mxu0 %v1411_v19 }
 0x128   :  { %460 = vperm.xlu1 %1458, %v390_v16   ;;  %455 = vperm.xlu0 %1457, %v389_v17   ;;  %v370_v16 = vld [vmem:[#allocation2 + $0x48] sm:$0xff]  ;;  %v352_v17 = vld [vmem:[%s1910_s4 + $0x38] sm:$0xff] }
 0x12a   :  { %1382 = vmatpush3.bf16.msra.mxu1 %v1379_v18  ;;  %1414 = vmatpush3.bf16.msra.mxu0 %v1411_v19 }
 0x12b   :  { %1384 = vmatprep.subr.bf16.mxu1 %v1383_v26  ;;  %1416 = vmatprep.subr.bf16.mxu0 %v1415_v29 }
 0x12c   :  { %470 = vperm.xlu1 %1458, %v392_v24   ;;  %465 = vperm.xlu0 %1457, %v391_v25  }
 0x12e   :  { %1386 = vmatpush3.bf16.msra.mxu1 %v1383_v26  ;;  %1418 = vmatpush3.bf16.msra.mxu0 %v1415_v29  ;;  %v354_v26 = vld [vmem:[%s1910_s4 + $0x48] sm:$0xff] }
 0x12f   :  { %1388 = vmatprep.subr.bf16.mxu1 %v1387_v32  ;;  %1420 = vmatprep.subr.bf16.mxu0 %v1419_v33 }
 0x132   :  { %1390 = vmatpush3.bf16.msra.mxu1 %v1387_v32  ;;  %1422 = vmatpush3.bf16.msra.mxu0 %v1419_v33  ;;  %v355_v32 = vld [vmem:[%s1910_s4 + $0x50] sm:$0xff] }
 0x18f   :  { %v406_v36 = vpop.permute.xlu1 %405  ;;  %v396_v37 = vpop.permute.xlu0 %395 }
 0x190   :  { %v473_v39 = vmul.f32 %v396_v37, %v361_v34  ;;  %v475_v40 = vmul.f32 %v406_v36, %v363_v35  ;;  %v373_v35 = vld [vmem:[#allocation2 + $0x60] sm:$0xff] }
 0x192   :  { %v521_v43 = vmul.f32 %v473_v39, %v345_v38  ;;  %v489_v44 = vadd.f32 %v473_v39, %v345_v38  ;;  %v491_v50 = vadd.f32 %v475_v40, %v347_v42  ;;  %v523_v51 = vmul.f32 %v475_v40, %v347_v42  ;;  %v374_v40 = vld [vmem:[#allocation2 + $0x68] sm:$0xff] }
 0x193   :  { %v411_v45 = vpop.permute.xlu1 %410  ;;  %v401_v47 = vpop.permute.xlu0 %400 }
 0x194   :  { %v474_v49 = vmul.f32 %v401_v47, %v362_v41  ;;  %1247 = vmatprep.mubr.f32.mxu1 %v521_v43  ;;  %1303 = vmatprep.mubr.f32.mxu0 %v489_v44  ;;  %v476_v53 = vmul.f32 %v411_v45, %v364_v46  ;;  %v356_v41 = vld [vmem:[%s1910_s4 + $0x58] sm:$0xff]  ;;  %v357_v44 = vld [vmem:[%s1910_s4 + $0x60] sm:$0xff]  ;;  %v375_v47 = vld [vmem:[#allocation2 + $0x70] sm:$0xff] }
 0x196   :  { %v490_v54 = vadd.f32 %v474_v49, %v346_v48  ;;  %v522_v55 = vmul.f32 %v474_v49, %v346_v48  ;;  %v492_v0 = vadd.f32 %v476_v53, %v348_v57  ;;  %v524_v1 = vmul.f32 %v476_v53, %v348_v57 }
 0x197   :  { %v421_v58 = vpop.permute.xlu1 %420  ;;  %v416_v59 = vpop.permute.xlu0 %415 }
 0x198   :  { %v477_v61 = vmul.f32 %v416_v59, %v365_v52  ;;  %1248 = vmatmul.mubr.f32.vlgmr.msra.gmra.mrb[0].mxu1 %v522_v55  ;;  %1304 = vmatmul.mubr.f32.vlgmr.msra.gmra.mrb[0].mxu0 %v490_v54  ;;  %v478_v62 = vmul.f32 %v421_v58, %v366_v56  ;;  %v376_v54 = vld [vmem:[#allocation2 + $0x78] sm:$0xff]  ;;  %v359_v56 = vld [vmem:[%s1910_s4 + $0x70] sm:$0xff] }
 0x199   :  { %1250 = vmatprep.mubr.f32.mxu1 %v523_v51  ;;  %1306 = vmatprep.mubr.f32.mxu0 %v491_v50  ;;  %v358_v50 = vld [vmem:[%s1910_s4 + $0x68] sm:$0xff] }
 0x19a   :  { %v493_v3 = vadd.f32 %v477_v61, %v349_v60  ;;  %v525_v4 = vmul.f32 %v477_v61, %v349_v60  ;;  %v494_v10 = vadd.f32 %v478_v62, %v350_v2  ;;  %v526_v12 = vmul.f32 %v478_v62, %v350_v2 }
 0x19b   :  { %v431_v5 = vpop.permute.xlu1 %430  ;;  %v426_v7 = vpop.permute.xlu0 %425 }
 0x19c   :  { %v479_v9 = vmul.f32 %v426_v7, %v367_v63  ;;  %1251 = vmatmul.mubr.f32.gmra.mrb[2].mxu1 %v524_v1  ;;  %1307 = vmatmul.mubr.f32.gmra.mrb[2].mxu0 %v492_v0  ;;  %v480_v13 = vmul.f32 %v431_v5, %v368_v6  ;;  %v360_v63 = vld [vmem:[%s1910_s4 + $0x78] sm:$0xff] }
 0x19d   :  { %1253 = vmatprep.mubr.f32.mxu1 %v525_v4  ;;  %1309 = vmatprep.mubr.f32.mxu0 %v493_v3 }
 0x19e   :  { %v495_v14 = vadd.f32 %v479_v9, %v351_v8  ;;  %v527_v15 = vmul.f32 %v479_v9, %v351_v8  ;;  %v496_v24 = vadd.f32 %v480_v13, %v352_v17  ;;  %v528_v25 = vmul.f32 %v480_v13, %v352_v17 }
 0x19f   :  { %v441_v18 = vpop.permute.xlu1 %440  ;;  %v436_v19 = vpop.permute.xlu0 %435 }
 0x1a0   :  { %v481_v21 = vmul.f32 %v436_v19, %v369_v11  ;;  %1254 = vmatmul.mubr.f32.gmra.mrb[4].mxu1 %v526_v12  ;;  %1310 = vmatmul.mubr.f32.gmra.mrb[4].mxu0 %v494_v10  ;;  %v482_v22 = vmul.f32 %v441_v18, %v370_v16 }
 0x1a1   :  { %1256 = vmatprep.mubr.f32.mxu1 %v527_v15  ;;  %1312 = vmatprep.mubr.f32.mxu0 %v495_v14 }
 0x1a2   :  { %v497_v27 = vadd.f32 %v481_v21, %v353_v20  ;;  %v529_v28 = vmul.f32 %v481_v21, %v353_v20  ;;  %v498_v34 = vadd.f32 %v482_v22, %v354_v26  ;;  %v530_v36 = vmul.f32 %v482_v22, %v354_v26 }
 0x1a3   :  { %v451_v29 = vpop.permute.xlu1 %450  ;;  %v446_v31 = vpop.permute.xlu0 %445 }
 0x1a4   :  { %v483_v33 = vmul.f32 %v446_v31, %v371_v23  ;;  %1257 = vmatmul.mubr.f32.gmra.mrb[6].mxu1 %v528_v25  ;;  %1313 = vmatmul.mubr.f32.gmra.mrb[6].mxu0 %v496_v24  ;;  %v484_v37 = vmul.f32 %v451_v29, %v372_v30 }
 0x1a5   :  { %1259 = vmatprep.mubr.f32.mxu1 %v529_v28  ;;  %1315 = vmatprep.mubr.f32.mxu0 %v497_v27 }
 0x1a6   :  { %v499_v38 = vadd.f32 %v483_v33, %v355_v32  ;;  %v531_v39 = vmul.f32 %v483_v33, %v355_v32  ;;  %v500_v48 = vadd.f32 %v484_v37, %v356_v41  ;;  %v532_v49 = vmul.f32 %v484_v37, %v356_v41 }
 0x1a7   :  { %v461_v42 = vpop.permute.xlu1 %460  ;;  %v456_v43 = vpop.permute.xlu0 %455 }
 0x1a8   :  { %v485_v45 = vmul.f32 %v456_v43, %v373_v35  ;;  %1260 = vmatmul.mubr.f32.gmra.mrb[8].mxu1 %v530_v36  ;;  %1316 = vmatmul.mubr.f32.gmra.mrb[8].mxu0 %v498_v34  ;;  %v486_v46 = vmul.f32 %v461_v42, %v374_v40 }
 0x1a9   :  { %1262 = vmatprep.mubr.f32.mxu1 %v531_v39  ;;  %1318 = vmatprep.mubr.f32.mxu0 %v499_v38 }
 0x1aa   :  { %v501_v51 = vadd.f32 %v485_v45, %v357_v44  ;;  %v533_v52 = vmul.f32 %v485_v45, %v357_v44  ;;  %v502_v58 = vadd.f32 %v486_v46, %v358_v50  ;;  %v534_v59 = vmul.f32 %v486_v46, %v358_v50 }
 0x1ab   :  { %v471_v53 = vpop.permute.xlu1 %470  ;;  %v466_v55 = vpop.permute.xlu0 %465 }
 0x1ac   :  { %v487_v57 = vmul.f32 %v466_v55, %v375_v47  ;;  %1263 = vmatmul.mubr.f32.gmra.mrb[10].mxu1 %v532_v49  ;;  %1319 = vmatmul.mubr.f32.gmra.mrb[10].mxu0 %v500_v48  ;;  %v488_v60 = vmul.f32 %v471_v53, %v376_v54 }
 0x1ad   :  { %1265 = vmatprep.mubr.f32.mxu1 %v533_v52  ;;  %1321 = vmatprep.mubr.f32.mxu0 %v501_v51 }
 0x1ae   :  { %v503_v61 = vadd.f32 %v487_v57, %v359_v56  ;;  %v535_v62 = vmul.f32 %v487_v57, %v359_v56  ;;  %v504_v0 = vadd.f32 %v488_v60, %v360_v63  ;;  %v536_v1 = vmul.f32 %v488_v60, %v360_v63 }
 0x1b0   :  { %1266 = vmatmul.mubr.f32.gmra.mrb[12].mxu1 %v534_v59  ;;  %1322 = vmatmul.mubr.f32.gmra.mrb[12].mxu0 %v502_v58 }
 0x1b1   :  { %1268 = vmatprep.mubr.f32.mxu1 %v535_v62  ;;  %1324 = vmatprep.mubr.f32.mxu0 %v503_v61 }
 0x1b4   :  { %1269 = vmatmul.mubr.f32.gmra.mrb[14].mxu1 %v536_v1  ;;  %1325 = vmatmul.mubr.f32.gmra.mrb[14].mxu0 %v504_v0 }
 0x26b   :  { %v1249_v2 = vpop.f32.mrb[0].mxu1  ;;  %v1305_v3 = vpop.f32.mrb[0].mxu0 }
 0x26c   :  { %v770_v4 = vadd.f32 %v1305_v3, %v1249_v2  ;;  %v619_v5 = vpop.f32.mrb[1].mxu1  ;;  %v764_v6 = vpop.f32.mrb[1].mxu0 }
 0x26d   :  { %v765_v7 = vadd.f32 %v764_v6, %v619_v5 }
 0x26e   :  { %v860_v8 = vmul.f32 0.2, %v770_v4  ;;  %vm844_vm0 = vcmp.gt.f32.partialorder %v770_v4, 0.0 }
 0x26f   :  { %v859_v9 = vmul.f32 0.2, %v765_v7  ;;  %v1252_v10 = vpop.f32.mrb[2].mxu1  ;;  %v1308_v11 = vpop.f32.mrb[2].mxu0  ;;  %vm843_vm1 = vcmp.gt.f32.partialorder %v765_v7, 0.0 }
 0x270   :  { %v780_v12 = vadd.f32 %v1308_v11, %v1252_v10  ;;  %v629_v13 = vpop.f32.mrb[3].mxu1  ;;  %v774_v14 = vpop.f32.mrb[3].mxu0  ;;  %v1780_v15 = vsel %vm844_vm0, %v770_v4, %v860_v8 }
 0x271   :  { %v775_v16 = vadd.f32 %v774_v14, %v629_v13  ;;  %v892_v17 = vmul.f32 %v1780_v15, %v1780_v15  ;;  %v1784_v18 = vsel %vm843_vm1, %v765_v7, %v859_v9 }
 0x272   :  { %v862_v19 = vmul.f32 0.2, %v780_v12  ;;  %v891_v20 = vmul.f32 %v1784_v18, %v1784_v18  ;;  %vm846_vm2 = vcmp.gt.f32.partialorder %v780_v12, 0.0 }
 0x273   :  { %v861_v21 = vmul.f32 0.2, %v775_v16  ;;  %v1255_v22 = vpop.f32.mrb[4].mxu1  ;;  %909 = vadd.xlane.f32.xlu1 %v892_v17  ;;  %v1311_v23 = vpop.f32.mrb[4].mxu0  ;;  %vm845_vm3 = vcmp.gt.f32.partialorder %v775_v16, 0.0 }
 0x274   :  { %v790_v24 = vadd.f32 %v1311_v23, %v1255_v22  ;;  %v639_v25 = vpop.f32.mrb[5].mxu1  ;;  %v784_v26 = vpop.f32.mrb[5].mxu0  ;;  %907 = vadd.xlane.f32.xlu0 %v891_v20  ;;  %v1788_v27 = vsel %vm846_vm2, %v780_v12, %v862_v19 }
 0x275   :  { %v785_v28 = vadd.f32 %v784_v26, %v639_v25  ;;  %v894_v29 = vmul.f32 %v1788_v27, %v1788_v27  ;;  %v1792_v34 = vsel %vm845_vm3, %v775_v16, %v861_v21 }
 0x276   :  { %v864_v30 = vmul.f32 0.2, %v790_v24  ;;  %vm848_vm5 = vcmp.gt.f32.partialorder %v790_v24, 0.0  ;;  %v893_v42 = vmul.f32 %v1792_v34, %v1792_v34 }
 0x277   :  { %v863_v31 = vmul.f32 0.2, %v785_v28  ;;  %v1258_v32 = vpop.f32.mrb[6].mxu1  ;;  %v1314_v33 = vpop.f32.mrb[6].mxu0  ;;  %vm847_vm4 = vcmp.gt.f32.partialorder %v785_v28, 0.0 }
 0x278   :  { %v800_v35 = vadd.f32 %v1314_v33, %v1258_v32  ;;  %v649_v36 = vpop.f32.mrb[7].mxu1  ;;  %v794_v37 = vpop.f32.mrb[7].mxu0  ;;  %913 = vadd.xlane.f32.xlu0 %v894_v29  ;;  %v1800_v46 = vsel %vm848_vm5, %v790_v24, %v864_v30 }
 0x279   :  { %v795_v38 = vadd.f32 %v794_v37, %v649_v36  ;;  %v1794_v39 = vsel %vm847_vm4, %v785_v28, %v863_v31  ;;  %v896_v54 = vmul.f32 %v1800_v46, %v1800_v46 }
 0x27a   :  { %v866_v40 = vmul.f32 0.2, %v800_v35  ;;  %v895_v41 = vmul.f32 %v1794_v39, %v1794_v39  ;;  %vm850_vm7 = vcmp.gt.f32.partialorder %v800_v35, 0.0 }
 0x27b   :  { %v865_v43 = vmul.f32 0.2, %v795_v38  ;;  %v1261_v44 = vpop.f32.mrb[8].mxu1  ;;  %v1317_v45 = vpop.f32.mrb[8].mxu0  ;;  %vm849_vm6 = vcmp.gt.f32.partialorder %v795_v38, 0.0 }
 0x27c   :  { %v810_v47 = vadd.f32 %v1317_v45, %v1261_v44  ;;  %v659_v48 = vpop.f32.mrb[9].mxu1  ;;  %v804_v49 = vpop.f32.mrb[9].mxu0  ;;  %915 = vadd.xlane.f32.xlu1 %v895_v41  ;;  %911 = vadd.xlane.f32.xlu0 %v893_v42  ;;  %v1808_v58 = vsel %vm850_vm7, %v800_v35, %v866_v40 }
 0x27d   :  { %v805_v50 = vadd.f32 %v804_v49, %v659_v48  ;;  %v1802_v51 = vsel %vm849_vm6, %v795_v38, %v865_v43  ;;  %v898_v2 = vmul.f32 %v1808_v58, %v1808_v58 }
 0x27e   :  { %v868_v52 = vmul.f32 0.2, %v810_v47  ;;  %v897_v53 = vmul.f32 %v1802_v51, %v1802_v51  ;;  %vm852_vm9 = vcmp.gt.f32.partialorder %v810_v47, 0.0 }
 0x27f   :  { %v867_v55 = vmul.f32 0.2, %v805_v50  ;;  %v1264_v56 = vpop.f32.mrb[10].mxu1  ;;  %v1320_v57 = vpop.f32.mrb[10].mxu0  ;;  %vm851_vm8 = vcmp.gt.f32.partialorder %v805_v50, 0.0 }
 0x280   :  { %v820_v59 = vadd.f32 %v1320_v57, %v1264_v56  ;;  %v669_v60 = vpop.f32.mrb[11].mxu1  ;;  %v814_v61 = vpop.f32.mrb[11].mxu0  ;;  %919 = vadd.xlane.f32.xlu1 %v897_v53  ;;  %917 = vadd.xlane.f32.xlu0 %v896_v54  ;;  %v1816_v6 = vsel %vm852_vm9, %v810_v47, %v868_v52 }
 0x281   :  { %v815_v62 = vadd.f32 %v814_v61, %v669_v60  ;;  %v1810_v63 = vsel %vm851_vm8, %v805_v50, %v867_v55  ;;  %v900_v14 = vmul.f32 %v1816_v6, %v1816_v6 }
 0x282   :  { %v870_v0 = vmul.f32 0.2, %v820_v59  ;;  %v899_v1 = vmul.f32 %v1810_v63, %v1810_v63  ;;  %vm854_vm11 = vcmp.gt.f32.partialorder %v820_v59, 0.0 }
 0x283   :  { %v869_v3 = vmul.f32 0.2, %v815_v62  ;;  %v1267_v4 = vpop.f32.mrb[12].mxu1  ;;  %v1323_v5 = vpop.f32.mrb[12].mxu0  ;;  %vm853_vm10 = vcmp.gt.f32.partialorder %v815_v62, 0.0 }
 0x284   :  { %v830_v7 = vadd.f32 %v1323_v5, %v1267_v4  ;;  %v679_v8 = vpop.f32.mrb[13].mxu1  ;;  %v824_v9 = vpop.f32.mrb[13].mxu0  ;;  %923 = vadd.xlane.f32.xlu1 %v899_v1  ;;  %921 = vadd.xlane.f32.xlu0 %v898_v2  ;;  %v1824_v20 = vsel %vm854_vm11, %v820_v59, %v870_v0 }
 0x285   :  { %v825_v10 = vadd.f32 %v824_v9, %v679_v8  ;;  %v1818_v11 = vsel %vm853_vm10, %v815_v62, %v869_v3  ;;  %v902_v28 = vmul.f32 %v1824_v20, %v1824_v20 }
 0x286   :  { %v872_v12 = vmul.f32 0.2, %v830_v7  ;;  %v901_v13 = vmul.f32 %v1818_v11, %v1818_v11  ;;  %vm856_vm13 = vcmp.gt.f32.partialorder %v830_v7, 0.0 }
 0x287   :  { %v871_v16 = vmul.f32 0.2, %v825_v10  ;;  %v1270_v17 = vpop.f32.mrb[14].mxu1  ;;  %v1326_v19 = vpop.f32.mrb[14].mxu0  ;;  %vm855_vm12 = vcmp.gt.f32.partialorder %v825_v10, 0.0 }
 0x288   :  { %v840_v21 = vadd.f32 %v1326_v19, %v1270_v17  ;;  %v689_v22 = vpop.f32.mrb[15].mxu1  ;;  %v834_v23 = vpop.f32.mrb[15].mxu0  ;;  %927 = vadd.xlane.f32.xlu1 %v901_v13  ;;  %925 = vadd.xlane.f32.xlu0 %v900_v14  ;;  %v1832_v31 = vsel %vm856_vm13, %v830_v7, %v872_v12 }
 0x289   :  { %v835_v24 = vadd.f32 %v834_v23, %v689_v22  ;;  %v1826_v25 = vsel %vm855_vm12, %v825_v10, %v871_v16  ;;  %v904_v35 = vmul.f32 %v1832_v31, %v1832_v31 }
 0x28a   :  { %v903_v26 = vmul.f32 %v1826_v25, %v1826_v25  ;;  %v874_v29 = vmul.f32 0.2, %v840_v21  ;;  %vm858_vm15 = vcmp.gt.f32.partialorder %v840_v21, 0.0 }
 0x28b   :  { %v873_v30 = vmul.f32 0.2, %v835_v24  ;;  %vm857_vm14 = vcmp.gt.f32.partialorder %v835_v24, 0.0 }
 0x28c   :  { %931 = vadd.xlane.f32.xlu1 %v903_v26  ;;  %929 = vadd.xlane.f32.xlu0 %v902_v28  ;;  %v1840_v36 = vsel %vm858_vm15, %v840_v21, %v874_v29 }
 0x28d   :  { %v1834_v32 = vsel %vm857_vm14, %v835_v24, %v873_v30  ;;  %v906_v37 = vmul.f32 %v1840_v36, %v1840_v36 }
 0x28e   :  { %v905_v33 = vmul.f32 %v1834_v32, %v1834_v32 }
 0x290   :  { %935 = vadd.xlane.f32.xlu1 %v905_v33  ;;  %933 = vadd.xlane.f32.xlu0 %v904_v35 }
 0x294   :  { %937 = vadd.xlane.f32.xlu0 %v906_v37 }
 0x300   :  { %v910_v38 = vpop.xlane.xlu1 %909 }
 0x301   :  { %v940_v40 = vmax.f32 %v910_v38, 1e-24  ;;  %v908_v41 = vpop.xlane.xlu0 %907 }
 0x302   :  { %v939_v42 = vmax.f32 %v908_v41, 1e-24 }
 0x303   :  { %1459 = vrsqrt.f32 %v940_v40 }
 0x304   :  { %1461 = vrsqrt.f32 %v939_v42 }
 0x305   :  { %v914_v43 = vpop.xlane.xlu0 %913 }
 0x306   :  { %v942_v44 = vmax.f32 %v914_v43, 1e-24 }
 0x308   :  { %1463 = vrsqrt.f32 %v942_v44 }
 0x309   :  { %v916_v45 = vpop.xlane.xlu1 %915  ;;  %v912_v47 = vpop.xlane.xlu0 %911 }
 0x30a   :  { %v943_v48 = vmax.f32 %v916_v45, 1e-24  ;;  %v941_v49 = vmax.f32 %v912_v47, 1e-24 }
 0x30c   :  { %1465 = vrsqrt.f32 %v943_v48 }
 0x30d   :  { %v1460_v50 = vpop.eup %1459  ;;  %1467 = vrsqrt.f32 %v941_v49  ;;  %v920_v52 = vpop.xlane.xlu1 %919 }
 0x30e   :  { %v918_v53 = vpop.xlane.xlu0 %917  ;;  %v1462_v54 = vpop.eup %1461  ;;  %v972_v55 = vmul.f32 %v1460_v50, %v1780_v15  ;;  %v945_v56 = vmax.f32 %v920_v52, 1e-24 }
 0x30f   :  { %v944_v57 = vmax.f32 %v918_v53, 1e-24  ;;  %v971_v59 = vmul.f32 %v1462_v54, %v1784_v18 }
 0x310   :  { %988 = vst [vmem:[%s1914_s8 + $0x8] sm:$0xff] %v972_v55  ;;  %1469 = vrsqrt.f32 %v945_v56 }
 0x311   :  { %987 = vst [vmem:[%s1914_s8] sm:$0xff] %v971_v59  ;;  %1471 = vrsqrt.f32 %v944_v57  ;;  %v924_v60 = vpop.xlane.xlu1 %923 }
 0x312   :  { %v922_v61 = vpop.xlane.xlu0 %921  ;;  %v1464_v62 = vpop.eup %1463  ;;  %v947_v0 = vmax.f32 %v924_v60, 1e-24 }
 0x313   :  { %v946_v1 = vmax.f32 %v922_v61, 1e-24  ;;  %v974_v15 = vmul.f32 %v1464_v62, %v1788_v27 }
 0x314   :  { %1473 = vrsqrt.f32 %v947_v0 }
 0x315   :  { %990 = vst [vmem:[%s1914_s8 + $0x18] sm:$0xff] %v974_v15  ;;  %1475 = vrsqrt.f32 %v946_v1  ;;  %v928_v18 = vpop.xlane.xlu1 %927 }
 0x316   :  { %v926_v2 = vpop.xlane.xlu0 %925  ;;  %v1466_v3 = vpop.eup %1465  ;;  %v949_v4 = vmax.f32 %v928_v18, 1e-24 }
 0x317   :  { %v948_v5 = vmax.f32 %v926_v2, 1e-24  ;;  %v1468_v7 = vpop.eup %1467  ;;  %v975_v8 = vmul.f32 %v1466_v3, %v1794_v39 }
 0x318   :  { %v973_v9 = vmul.f32 %v1468_v7, %v1792_v34  ;;  %1477 = vrsqrt.f32 %v949_v4 }
 0x319   :  { %991 = vst [vmem:[%s1914_s8 + $0x20] sm:$0xff] %v975_v8  ;;  %1479 = vrsqrt.f32 %v948_v5  ;;  %v932_v27 = vpop.xlane.xlu1 %931 }
 0x31a   :  { %v930_v10 = vpop.xlane.xlu0 %929  ;;  %v1470_v12 = vpop.eup %1469  ;;  %989 = vst [vmem:[%s1914_s8 + $0x10] sm:$0xff] %v973_v9  ;;  %v951_v13 = vmax.f32 %v932_v27, 1e-24 }
 0x31b   :  { %v950_v14 = vmax.f32 %v930_v10, 1e-24  ;;  %v1472_v16 = vpop.eup %1471  ;;  %v977_v39 = vmul.f32 %v1470_v12, %v1802_v51 }
 0x31c   :  { %v976_v34 = vmul.f32 %v1472_v16, %v1800_v46  ;;  %1481 = vrsqrt.f32 %v951_v13 }
 0x31d   :  { %993 = vst [vmem:[%s1914_s8 + $0x30] sm:$0xff] %v977_v39  ;;  %1483 = vrsqrt.f32 %v950_v14  ;;  %v936_v17 = vpop.xlane.xlu1 %935 }
 0x31e   :  { %v934_v19 = vpop.xlane.xlu0 %933  ;;  %v1474_v21 = vpop.eup %1473  ;;  %992 = vst [vmem:[%s1914_s8 + $0x28] sm:$0xff] %v976_v34  ;;  %v953_v22 = vmax.f32 %v936_v17, 1e-24 }
 0x31f   :  { %v952_v23 = vmax.f32 %v934_v19, 1e-24  ;;  %v1476_v24 = vpop.eup %1475  ;;  %v979_v51 = vmul.f32 %v1474_v21, %v1810_v63 }
 0x320   :  { %v978_v46 = vmul.f32 %v1476_v24, %v1808_v58  ;;  %1485 = vrsqrt.f32 %v953_v22 }
 0x321   :  { %995 = vst [vmem:[%s1914_s8 + $0x40] sm:$0xff] %v979_v51  ;;  %1487 = vrsqrt.f32 %v952_v23 }
 0x322   :  { %v938_v26 = vpop.xlane.xlu0 %937  ;;  %v1478_v28 = vpop.eup %1477  ;;  %994 = vst [vmem:[%s1914_s8 + $0x38] sm:$0xff] %v978_v46 }
 0x323   :  { %v954_v29 = vmax.f32 %v938_v26, 1e-24  ;;  %v1480_v30 = vpop.eup %1479  ;;  %v981_v33 = vmul.f32 %v1478_v28, %v1818_v11 }
 0x324   :  { %v980_v63 = vmul.f32 %v1480_v30, %v1816_v6 }
 0x325   :  { %1489 = vrsqrt.f32 %v954_v29  ;;  %997 = vst [vmem:[%s1914_s8 + $0x50] sm:$0xff] %v981_v33 }
 0x326   :  { %v1482_v58 = vpop.eup %1481  ;;  %996 = vst [vmem:[%s1914_s8 + $0x48] sm:$0xff] %v980_v63 }
 0x327   :  { %v1484_v35 = vpop.eup %1483  ;;  %v983_v37 = vmul.f32 %v1482_v58, %v1826_v25 }
 0x328   :  { %v982_v38 = vmul.f32 %v1484_v35, %v1824_v20 }
 0x329   :  { %999 = vst [vmem:[%s1914_s8 + $0x60] sm:$0xff] %v983_v37 }
 0x32a   :  { %v1486_v6 = vpop.eup %1485  ;;  %998 = vst [vmem:[%s1914_s8 + $0x58] sm:$0xff] %v982_v38 }
 0x32b   :  { %v1488_v11 = vpop.eup %1487  ;;  %v985_v40 = vmul.f32 %v1486_v6, %v1834_v32 }
 0x32c   :  { %v984_v41 = vmul.f32 %v1488_v11, %v1832_v31 }
 0x32d   :  { %1001 = vst [vmem:[%s1914_s8 + $0x70] sm:$0xff] %v985_v40 }
 0x32e   :  { %1000 = vst [vmem:[%s1914_s8 + $0x68] sm:$0xff] %v984_v41 }
 0x32f   :  { %v1490_v25 = vpop.eup %1489 }
 0x330   :  { %v986_v20 = vmul.f32 %v1490_v25, %v1840_v36 }
 0x332   :  { %1002 = vst [vmem:[%s1914_s8 + $0x78] sm:$0xff] %v986_v20 }

</bundles_post_ra>
